<compile_context>
chip_gen: v6e
topology: v6e:2x2x1
jax: 0.10.0
libtpu: 0.0.40
codegen_flags: <defaults>
</compile_context>

<pallas_src>
import functools

import jax
import jax.numpy as jnp
from jax.experimental import pallas as pl
from jax.experimental.pallas import tpu as pltpu

EPS = 1e-4  # LayerNorm eps in the reference module


def _im2col(x, k):
    """x: (C, T) with >= k//2 zero lanes past the valid signal on the lane axis.

    Returns (k*C, T): rows [j*C:(j+1)*C] hold x shifted by (j - k//2) time
    steps ('same' conv padding).  Pure lane rotations (XLU) - no wrap masks:
    left wraps pull in zeros, right wraps land only in masked padding columns.
    Sublane concat stays aligned because C % 8 == 0 for GlowTTS widths.
    """
    pad = k // 2
    T = x.shape[1]
    cols = []
    for j in range(k):
        off = j - pad
        cols.append(x if off == 0 else pltpu.roll(x, shift=(-off) % T, axis=1))
    return jnp.concatenate(cols, axis=0)


def duration_predictor_kernel(spect_ref, mask_ref,
                              w1_ref, b1_ref, g1_ref, be1_ref,
                              w2_ref, b2_ref, gw2_ref, c2_ref,
                              out_ref, *, k):
    # One grid step = one batch element (real pipeline + megacore sharding).
    x = spect_ref[0].astype(jnp.float32)   # (Cin, Tp)
    m = mask_ref[0].astype(jnp.float32)    # (1, Tp), binary sequence mask

    # conv_1: k taps fused into one MXU matmul, then relu.
    # Activations are cast to the weight dtype (f32 by default; bf16 when the
    # wrapper is asked for bf16 MXU inputs on v6e/v7x).
    h = jnp.dot(w1_ref[...], _im2col(x * m, k).astype(w1_ref.dtype),
                preferred_element_type=jnp.float32) + b1_ref[...]
    h = jnp.maximum(h, 0.0)

    # LayerNorm 1 (two-pass channel stats; per time column).
    inv_c = 1.0 / h.shape[0]
    mean = jnp.sum(h, axis=0, keepdims=True) * inv_c
    d = h - mean
    var = jnp.sum(d * d, axis=0, keepdims=True) * inv_c
    h = d * jax.lax.rsqrt(var + EPS) * g1_ref[...] + be1_ref[...]
    # TODO(synk): dropout is identity (inference); training-mode RNG dropout omitted.

    # conv_2 -> relu
    h = jnp.dot(w2_ref[...], _im2col(h * m, k).astype(w2_ref.dtype),
                preferred_element_type=jnp.float32) + b2_ref[...]
    h = jnp.maximum(h, 0.0)

    # LayerNorm 2 fused with the 1x1 projection (binary mask assumed):
    #   proj(LN2(h)*m)*m == (rsqrt(var+eps)*sum_c(d_c*g2_c*wp_c)
    #                        + dot(be2, wp) + bp) * m
    mean = jnp.sum(h, axis=0, keepdims=True) * inv_c
    d = h - mean
    var = jnp.sum(d * d, axis=0, keepdims=True) * inv_c
    y = (jnp.sum(d * gw2_ref[...], axis=0, keepdims=True)
         * jax.lax.rsqrt(var + EPS) + c2_ref[...])
    out_ref[0] = (y * m).astype(out_ref.dtype)   # lane-dense (1, Tp) row


def make_params(key, in_channels, filter_channels, kernel_size):
    """Deterministic synthetic parameters with PyTorch Conv1d-like shapes."""
    keys = jax.random.split(key, 6)

    def u(kk, shape, fan_in):
        bound = 1.0 / jnp.sqrt(jnp.float32(fan_in))
        return jax.random.uniform(kk, shape, jnp.float32, -bound, bound)

    return dict(
        w1=u(keys[0], (filter_channels, in_channels, kernel_size),
             in_channels * kernel_size),
        b1=u(keys[1], (filter_channels,), in_channels * kernel_size),
        g1=jnp.ones((filter_channels,), jnp.float32),
        be1=jnp.zeros((filter_channels,), jnp.float32),
        w2=u(keys[2], (filter_channels, filter_channels, kernel_size),
             filter_channels * kernel_size),
        b2=u(keys[3], (filter_channels,), filter_channels * kernel_size),
        g2=jnp.ones((filter_channels,), jnp.float32),
        be2=jnp.zeros((filter_channels,), jnp.float32),
        wp=u(keys[4], (1, filter_channels, 1), filter_channels),
        bp=u(keys[5], (1,), filter_channels),
    )


@functools.partial(jax.jit, static_argnames=("use_bf16_matmul",))
def duration_predictor(spect, mask, params, *, use_bf16_matmul=False):
    """spect: (B, Cin, T) f32; mask: (B, 1, T) {0,1} f32 -> durs: (B, T) f32."""
    B, Cin, T = spect.shape
    Fc, _, k = params['w1'].shape
    pad = k // 2

    # Lane-align the time axis AND leave >= k//2 zero lanes past T so im2col
    # needs no wrap-mask selects (see _im2col).
    Tp = ((T + pad + 127) // 128) * 128
    spect_p = jnp.pad(spect, ((0, 0), (0, 0), (0, Tp - T)))
    mask_p = jnp.pad(mask, ((0, 0), (0, 0), (0, Tp - T)))

    # bf16 MXU inputs: enable for production widths on v6e/v7x (exceeds the
    # f32 test tolerance); keep f32 on v5e / for validation.
    mm_dtype = jnp.bfloat16 if use_bf16_matmul else jnp.float32

    # Glue: weight reshapes only; activations keep the NCW layout.
    w1k = jnp.transpose(params['w1'], (0, 2, 1)).reshape(Fc, k * Cin).astype(mm_dtype)
    w2k = jnp.transpose(params['w2'], (0, 2, 1)).reshape(Fc, k * Fc).astype(mm_dtype)
    b1 = params['b1'].reshape(Fc, 1)
    b2 = params['b2'].reshape(Fc, 1)
    g1 = params['g1'].reshape(Fc, 1)
    be1 = params['be1'].reshape(Fc, 1)
    wp = params['wp'][0, :, 0]                                   # (Fc,)
    gw2 = (params['g2'] * wp).reshape(Fc, 1)                     # LN2 * proj fold
    c2 = (jnp.sum(params['be2'] * wp) + params['bp'][0]).reshape(1, 1)

    def full(shape):
        n = len(shape)
        return pl.BlockSpec(shape, lambda i, _n=n: (0,) * _n)

    kernel = functools.partial(duration_predictor_kernel, k=k)

    out = pl.pallas_call(
        kernel,
        out_shape=jax.ShapeDtypeStruct((B, 1, Tp), jnp.float32),
        grid_spec=pltpu.PrefetchScalarGridSpec(
            num_scalar_prefetch=0,
            grid=(B,),
            in_specs=[
                pl.BlockSpec((1, Cin, Tp), lambda i: (i, 0, 0)),   # spect (NCW)
                pl.BlockSpec((1, 1, Tp), lambda i: (i, 0, 0)),     # mask
                full((Fc, k * Cin)), full((Fc, 1)), full((Fc, 1)), full((Fc, 1)),
                full((Fc, k * Fc)), full((Fc, 1)), full((Fc, 1)), full((1, 1)),
            ],
            out_specs=pl.BlockSpec((1, 1, Tp), lambda i: (i, 0, 0)),
        ),
        compiler_params=pltpu.CompilerParams(
            dimension_semantics=("parallel",),       # batch steps independent
            vmem_limit_bytes=32 * 1024 * 1024),      # explicit (v5e default is 16 MiB)
    )(spect_p, mask_p, w1k, b1, g1, be1, w2k, b2, gw2, c2)
    # TODO(synk): for very long T on v7x (64 MiB VMEM) add a halo-tiled time grid
    # axis (pre-haloed (B, Cin, nt, Tt+2*128) layout, compute the centre Tt columns
    # per step) so per-step VMEM residency stays bounded.
    return out[:, 0, :T]


def ref_forward(spect, mask, params):
    """Pure-JAX (XLA) reference for numerical validation."""
    def conv1d(x, w, b, pad):
        y = jax.lax.conv_general_dilated(
            x, w, window_strides=(1,), padding=[(pad, pad)],
            dimension_numbers=('NCH', 'OIH', 'NCH'))
        return y + b[None, :, None]

    def ln(x, g, be):
        mean = jnp.mean(x, axis=1, keepdims=True)
        var = jnp.mean((x - mean) ** 2, axis=1, keepdims=True)
        return (x - mean) * jax.lax.rsqrt(var + EPS) * g[None, :, None] + be[None, :, None]

    pad = params['w1'].shape[-1] // 2
    h = conv1d(spect * mask, params['w1'], params['b1'], pad)
    h = jax.nn.relu(h)
    h = ln(h, params['g1'], params['be1'])
    h = conv1d(h * mask, params['w2'], params['b2'], pad)
    h = jax.nn.relu(h)
    h = ln(h, params['g2'], params['be2'])
    y = conv1d(h * mask, params['wp'], params['bp'], 0)
    return (y * mask)[:, 0, :]


if __name__ == "__main__":
    B, Cin, Fc, T, K = 2, 16, 32, 24, 3   # p_dropout unused (eval mode)

    key = jax.random.PRNGKey(0)
    kp, ks = jax.random.split(key, 2)
    params = make_params(kp, Cin, Fc, K)

    spect = jax.random.normal(ks, (B, Cin, T), jnp.float32)
    lengths = jnp.array([T, T - 5], jnp.int32)
    mask = (jnp.arange(T)[None, :] < lengths[:, None]).astype(jnp.float32)[:, None, :]

    durs = duration_predictor(spect, mask, params)
    durs = jax.block_until_ready(durs)

    ref = ref_forward(spect, mask, params)
    assert durs.shape == (B, T), durs.shape
    max_err = float(jnp.max(jnp.abs(durs - ref)))
    assert max_err < 5e-4, f"mismatch vs reference: {max_err}"

    print("KERNEL_OK")
</pallas_src>

<mosaic_0001>
module attributes {stable_mosaic.version = 11 : i64} {
  func.func @duration_predictor_kernel(%arg0: i32, %arg1: memref<1x16x128xf32, #tpu.memory_space<vmem>>, %arg2: memref<1x1x128xf32, #tpu.memory_space<vmem>>, %arg3: memref<32x48xf32, #tpu.memory_space<vmem>>, %arg4: memref<32x1xf32, #tpu.memory_space<vmem>>, %arg5: memref<32x1xf32, #tpu.memory_space<vmem>>, %arg6: memref<32x1xf32, #tpu.memory_space<vmem>>, %arg7: memref<32x96xf32, #tpu.memory_space<vmem>>, %arg8: memref<32x1xf32, #tpu.memory_space<vmem>>, %arg9: memref<32x1xf32, #tpu.memory_space<vmem>>, %arg10: memref<1x1xf32, #tpu.memory_space<vmem>>, %arg11: memref<1x1x128xf32, #tpu.memory_space<vmem>>) attributes {dimension_semantics = [#tpu.dimension_semantics<parallel>], iteration_bounds = array<i64: 2>, scalar_prefetch = 0 : i64, scratch_operands = 0 : i64, tpu.core_type = #tpu.core_type<tc>, window_params = [{transform_indices = @transform_0, window_bounds = array<i64: 1, 16, 128>}, {transform_indices = @transform_1, window_bounds = array<i64: 1, 1, 128>}, {pipeline_mode = #tpu.pipeline_mode<synchronous>, transform_indices = @transform_2, window_bounds = array<i64: 32, 48>}, {pipeline_mode = #tpu.pipeline_mode<synchronous>, transform_indices = @transform_3, window_bounds = array<i64: 32, 1>}, {pipeline_mode = #tpu.pipeline_mode<synchronous>, transform_indices = @transform_4, window_bounds = array<i64: 32, 1>}, {pipeline_mode = #tpu.pipeline_mode<synchronous>, transform_indices = @transform_5, window_bounds = array<i64: 32, 1>}, {pipeline_mode = #tpu.pipeline_mode<synchronous>, transform_indices = @transform_6, window_bounds = array<i64: 32, 96>}, {pipeline_mode = #tpu.pipeline_mode<synchronous>, transform_indices = @transform_7, window_bounds = array<i64: 32, 1>}, {pipeline_mode = #tpu.pipeline_mode<synchronous>, transform_indices = @transform_8, window_bounds = array<i64: 32, 1>}, {pipeline_mode = #tpu.pipeline_mode<synchronous>, transform_indices = @transform_9, window_bounds = array<i64: 1, 1>}, {transform_indices = @transform_10, window_bounds = array<i64: 1, 1, 128>}]} {
    %c0 = arith.constant 0 : index
    %c0_0 = arith.constant 0 : index
    %c0_1 = arith.constant 0 : index
    %0 = vector.load %arg1[%c0, %c0_0, %c0_1] : memref<1x16x128xf32, #tpu.memory_space<vmem>>, vector<1x16x128xf32>
    %1 = vector.shape_cast %0 : vector<1x16x128xf32> to vector<16x128xf32>
    %c0_2 = arith.constant 0 : index
    %c0_3 = arith.constant 0 : index
    %c0_4 = arith.constant 0 : index
    %2 = vector.load %arg2[%c0_2, %c0_3, %c0_4] : memref<1x1x128xf32, #tpu.memory_space<vmem>>, vector<1x1x128xf32>
    %3 = vector.shape_cast %2 : vector<1x1x128xf32> to vector<1x128xf32>
    %c0_5 = arith.constant 0 : index
    %c0_6 = arith.constant 0 : index
    %4 = vector.load %arg3[%c0_5, %c0_6] : memref<32x48xf32, #tpu.memory_space<vmem>>, vector<32x48xf32>
    %5 = vector.broadcast %3 : vector<1x128xf32> to vector<16x128xf32>
    %6 = arith.mulf %1, %5 : vector<16x128xf32>
    %c1_i32 = arith.constant 1 : i32
    %7 = tpu.dynamic_rotate %6 by %c1_i32 dim 1 : vector<16x128xf32>, i32 -> vector<16x128xf32>
    %c127_i32 = arith.constant 127 : i32
    %8 = tpu.dynamic_rotate %6 by %c127_i32 dim 1 : vector<16x128xf32>, i32 -> vector<16x128xf32>
    %9 = tpu.concatenate %7, %6, %8 in 0 : vector<16x128xf32>, vector<16x128xf32>, vector<16x128xf32> -> vector<48x128xf32>
    %cst = arith.constant dense<0.000000e+00> : vector<32x128xf32>
    %10 = tpu.matmul %4, %9, %cst {dimension_numbers = #tpu.dot_dimension_numbers<[1], [0], [0], [1], [0, 0, 1, 1], [], []>} : vector<32x48xf32>, vector<48x128xf32>, vector<32x128xf32> -> vector<32x128xf32>
    %c0_7 = arith.constant 0 : index
    %c0_8 = arith.constant 0 : index
    %11 = vector.load %arg4[%c0_7, %c0_8] : memref<32x1xf32, #tpu.memory_space<vmem>>, vector<32x1xf32>
    %12 = vector.broadcast %11 : vector<32x1xf32> to vector<32x128xf32>
    %13 = arith.addf %10, %12 : vector<32x128xf32>
    %cst_9 = arith.constant 0.000000e+00 : f32
    %14 = vector.broadcast %cst_9 : f32 to vector<32x128xf32>
    %15 = arith.maximumf %13, %14 : vector<32x128xf32>
    %cst_10 = arith.constant dense<0.000000e+00> : vector<128xf32>
    %16 = vector.multi_reduction <add>, %15, %cst_10 [0] : vector<32x128xf32> to vector<128xf32>
    %17 = vector.shape_cast %16 : vector<128xf32> to vector<1x128xf32>
    %cst_11 = arith.constant 3.125000e-02 : f32
    %18 = vector.broadcast %cst_11 : f32 to vector<1x128xf32>
    %19 = arith.mulf %17, %18 : vector<1x128xf32>
    %20 = vector.broadcast %19 : vector<1x128xf32> to vector<32x128xf32>
    %21 = arith.subf %15, %20 : vector<32x128xf32>
    %22 = arith.mulf %21, %21 : vector<32x128xf32>
    %cst_12 = arith.constant dense<0.000000e+00> : vector<128xf32>
    %23 = vector.multi_reduction <add>, %22, %cst_12 [0] : vector<32x128xf32> to vector<128xf32>
    %24 = vector.shape_cast %23 : vector<128xf32> to vector<1x128xf32>
    %cst_13 = arith.constant 3.125000e-02 : f32
    %25 = vector.broadcast %cst_13 : f32 to vector<1x128xf32>
    %26 = arith.mulf %24, %25 : vector<1x128xf32>
    %cst_14 = arith.constant 9.99999974E-5 : f32
    %27 = vector.broadcast %cst_14 : f32 to vector<1x128xf32>
    %28 = arith.addf %26, %27 : vector<1x128xf32>
    %29 = math.rsqrt %28 : vector<1x128xf32>
    %30 = vector.broadcast %29 : vector<1x128xf32> to vector<32x128xf32>
    %31 = arith.mulf %21, %30 : vector<32x128xf32>
    %c0_15 = arith.constant 0 : index
    %c0_16 = arith.constant 0 : index
    %32 = vector.load %arg5[%c0_15, %c0_16] : memref<32x1xf32, #tpu.memory_space<vmem>>, vector<32x1xf32>
    %33 = vector.broadcast %32 : vector<32x1xf32> to vector<32x128xf32>
    %34 = arith.mulf %31, %33 : vector<32x128xf32>
    %c0_17 = arith.constant 0 : index
    %c0_18 = arith.constant 0 : index
    %35 = vector.load %arg6[%c0_17, %c0_18] : memref<32x1xf32, #tpu.memory_space<vmem>>, vector<32x1xf32>
    %36 = vector.broadcast %35 : vector<32x1xf32> to vector<32x128xf32>
    %37 = arith.addf %34, %36 : vector<32x128xf32>
    %c0_19 = arith.constant 0 : index
    %c0_20 = arith.constant 0 : index
    %38 = vector.load %arg7[%c0_19, %c0_20] : memref<32x96xf32, #tpu.memory_space<vmem>>, vector<32x96xf32>
    %39 = vector.broadcast %3 : vector<1x128xf32> to vector<32x128xf32>
    %40 = arith.mulf %37, %39 : vector<32x128xf32>
    %c1_i32_21 = arith.constant 1 : i32
    %41 = tpu.dynamic_rotate %40 by %c1_i32_21 dim 1 : vector<32x128xf32>, i32 -> vector<32x128xf32>
    %c127_i32_22 = arith.constant 127 : i32
    %42 = tpu.dynamic_rotate %40 by %c127_i32_22 dim 1 : vector<32x128xf32>, i32 -> vector<32x128xf32>
    %43 = tpu.concatenate %41, %40, %42 in 0 : vector<32x128xf32>, vector<32x128xf32>, vector<32x128xf32> -> vector<96x128xf32>
    %cst_23 = arith.constant dense<0.000000e+00> : vector<32x128xf32>
    %44 = tpu.matmul %38, %43, %cst_23 {dimension_numbers = #tpu.dot_dimension_numbers<[1], [0], [0], [1], [0, 0, 1, 1], [], []>} : vector<32x96xf32>, vector<96x128xf32>, vector<32x128xf32> -> vector<32x128xf32>
    %c0_24 = arith.constant 0 : index
    %c0_25 = arith.constant 0 : index
    %45 = vector.load %arg8[%c0_24, %c0_25] : memref<32x1xf32, #tpu.memory_space<vmem>>, vector<32x1xf32>
    %46 = vector.broadcast %45 : vector<32x1xf32> to vector<32x128xf32>
    %47 = arith.addf %44, %46 : vector<32x128xf32>
    %cst_26 = arith.constant 0.000000e+00 : f32
    %48 = vector.broadcast %cst_26 : f32 to vector<32x128xf32>
    %49 = arith.maximumf %47, %48 : vector<32x128xf32>
    %cst_27 = arith.constant dense<0.000000e+00> : vector<128xf32>
    %50 = vector.multi_reduction <add>, %49, %cst_27 [0] : vector<32x128xf32> to vector<128xf32>
    %51 = vector.shape_cast %50 : vector<128xf32> to vector<1x128xf32>
    %cst_28 = arith.constant 3.125000e-02 : f32
    %52 = vector.broadcast %cst_28 : f32 to vector<1x128xf32>
    %53 = arith.mulf %51, %52 : vector<1x128xf32>
    %54 = vector.broadcast %53 : vector<1x128xf32> to vector<32x128xf32>
    %55 = arith.subf %49, %54 : vector<32x128xf32>
    %56 = arith.mulf %55, %55 : vector<32x128xf32>
    %cst_29 = arith.constant dense<0.000000e+00> : vector<128xf32>
    %57 = vector.multi_reduction <add>, %56, %cst_29 [0] : vector<32x128xf32> to vector<128xf32>
    %58 = vector.shape_cast %57 : vector<128xf32> to vector<1x128xf32>
    %cst_30 = arith.constant 3.125000e-02 : f32
    %59 = vector.broadcast %cst_30 : f32 to vector<1x128xf32>
    %60 = arith.mulf %58, %59 : vector<1x128xf32>
    %c0_31 = arith.constant 0 : index
    %c0_32 = arith.constant 0 : index
    %61 = vector.load %arg9[%c0_31, %c0_32] : memref<32x1xf32, #tpu.memory_space<vmem>>, vector<32x1xf32>
    %62 = vector.broadcast %61 : vector<32x1xf32> to vector<32x128xf32>
    %63 = arith.mulf %55, %62 : vector<32x128xf32>
    %cst_33 = arith.constant dense<0.000000e+00> : vector<128xf32>
    %64 = vector.multi_reduction <add>, %63, %cst_33 [0] : vector<32x128xf32> to vector<128xf32>
    %65 = vector.shape_cast %64 : vector<128xf32> to vector<1x128xf32>
    %cst_34 = arith.constant 9.99999974E-5 : f32
    %66 = vector.broadcast %cst_34 : f32 to vector<1x128xf32>
    %67 = arith.addf %60, %66 : vector<1x128xf32>
    %68 = math.rsqrt %67 : vector<1x128xf32>
    %69 = arith.mulf %65, %68 : vector<1x128xf32>
    %c0_35 = arith.constant 0 : index
    %c0_36 = arith.constant 0 : index
    %70 = vector.load %arg10[%c0_35, %c0_36] : memref<1x1xf32, #tpu.memory_space<vmem>>, vector<1x1xf32>
    %71 = vector.broadcast %70 : vector<1x1xf32> to vector<1x128xf32>
    %72 = arith.addf %69, %71 : vector<1x128xf32>
    %73 = arith.mulf %72, %3 : vector<1x128xf32>
    %c0_37 = arith.constant 0 : index
    %c0_38 = arith.constant 0 : index
    %c0_39 = arith.constant 0 : index
    %74 = vector.load %arg11[%c0_37, %c0_38, %c0_39] : memref<1x1x128xf32, #tpu.memory_space<vmem>>, vector<1x1x128xf32>
    %75 = vector.shape_cast %74 : vector<1x1x128xf32> to vector<1x128xf32>
    %76 = vector.shape_cast %73 : vector<1x128xf32> to vector<1x1x128xf32>
    tpu.vector_store %arg11[%c0_37, %c0_38, %c0_39], %76 {strides = array<i32>} : memref<1x1x128xf32, #tpu.memory_space<vmem>>, vector<1x1x128xf32>,
    return
  }
  func.func @transform_0(%arg0: i32) -> (i32, i32, i32) {
    %c0_i32 = arith.constant 0 : i32
    %c0_i32_0 = arith.constant 0 : i32
    %c0_i32_1 = arith.constant 0 : i32
    return %arg0, %c0_i32, %c0_i32_0 : i32, i32, i32
  }
  func.func @transform_1(%arg0: i32) -> (i32, i32, i32) {
    %c0_i32 = arith.constant 0 : i32
    %c0_i32_0 = arith.constant 0 : i32
    %c0_i32_1 = arith.constant 0 : i32
    return %arg0, %c0_i32, %c0_i32_0 : i32, i32, i32
  }
  func.func @transform_2(%arg0: i32) -> (i32, i32) {
    %c0_i32 = arith.constant 0 : i32
    %c0_i32_0 = arith.constant 0 : i32
    %c0_i32_1 = arith.constant 0 : i32
    return %c0_i32, %c0_i32_0 : i32, i32
  }
  func.func @transform_3(%arg0: i32) -> (i32, i32) {
    %c0_i32 = arith.constant 0 : i32
    %c0_i32_0 = arith.constant 0 : i32
    %c0_i32_1 = arith.constant 0 : i32
    return %c0_i32, %c0_i32_0 : i32, i32
  }
  func.func @transform_4(%arg0: i32) -> (i32, i32) {
    %c0_i32 = arith.constant 0 : i32
    %c0_i32_0 = arith.constant 0 : i32
    %c0_i32_1 = arith.constant 0 : i32
    return %c0_i32, %c0_i32_0 : i32, i32
  }
  func.func @transform_5(%arg0: i32) -> (i32, i32) {
    %c0_i32 = arith.constant 0 : i32
    %c0_i32_0 = arith.constant 0 : i32
    %c0_i32_1 = arith.constant 0 : i32
    return %c0_i32, %c0_i32_0 : i32, i32
  }
  func.func @transform_6(%arg0: i32) -> (i32, i32) {
    %c0_i32 = arith.constant 0 : i32
    %c0_i32_0 = arith.constant 0 : i32
    %c0_i32_1 = arith.constant 0 : i32
    return %c0_i32, %c0_i32_0 : i32, i32
  }
  func.func @transform_7(%arg0: i32) -> (i32, i32) {
    %c0_i32 = arith.constant 0 : i32
    %c0_i32_0 = arith.constant 0 : i32
    %c0_i32_1 = arith.constant 0 : i32
    return %c0_i32, %c0_i32_0 : i32, i32
  }
  func.func @transform_8(%arg0: i32) -> (i32, i32) {
    %c0_i32 = arith.constant 0 : i32
    %c0_i32_0 = arith.constant 0 : i32
    %c0_i32_1 = arith.constant 0 : i32
    return %c0_i32, %c0_i32_0 : i32, i32
  }
  func.func @transform_9(%arg0: i32) -> (i32, i32) {
    %c0_i32 = arith.constant 0 : i32
    %c0_i32_0 = arith.constant 0 : i32
    %c0_i32_1 = arith.constant 0 : i32
    return %c0_i32, %c0_i32_0 : i32, i32
  }
  func.func @transform_10(%arg0: i32) -> (i32, i32, i32) {
    %c0_i32 = arith.constant 0 : i32
    %c0_i32_0 = arith.constant 0 : i32
    %c0_i32_1 = arith.constant 0 : i32
    return %arg0, %c0_i32, %c0_i32_0 : i32, i32, i32
  }
}

</mosaic_0001>

<bundles_post_ra>
// kernel: duration_predictor.1
= control target key start
LH: loop header
LB: loop body
LE: loop exit
PB: predicated region body
PF: predicated region fallthrough
CT: control target
= control target key end

     0   :  { %s1397_s0 = inlined_call_operand.vmem [shape: f32[2,16,128], index: 0, kind: input, shape index: {}]   ;;  %s1398_s1 = inlined_call_operand.vmem [shape: f32[2,1,128], index: 1, kind: input, shape index: {}]   ;;  %s1399_s2 = inlined_call_operand.vmem [shape: f32[32,48], index: 2, kind: input, shape index: {}]   ;;  %s1400_s3 = inlined_call_operand.vmem [shape: f32[32,1], index: 3, kind: input, shape index: {}]   ;;  %s1401_s4 = inlined_call_operand.vmem [shape: f32[32,1], index: 4, kind: input, shape index: {}]   ;;  %s1402_s5 = inlined_call_operand.vmem [shape: f32[32,1], index: 5, kind: input, shape index: {}]   ;;  %s1403_s6 = inlined_call_operand.vmem [shape: f32[32,96], index: 6, kind: input, shape index: {}]   ;;  %s1404_s7 = inlined_call_operand.vmem [shape: f32[32,1], index: 7, kind: input, shape index: {}]   ;;  %s1405_s8 = inlined_call_operand.vmem [shape: f32[32,1], index: 8, kind: input, shape index: {}]   ;;  %s1406_s9 = inlined_call_operand.<no memory space> [shape: f32[1,1], index: 9, kind: input, shape index: {}]   ;;  %s1407_s10 = inlined_call_operand.hbm [shape: f32[2,1,128], index: 10, kind: output, shape index: {}]  }
   0x1   :  { %v15_v0 = vstv %s1406_s9 }
   0x2   :  { %16 = vst [vmem:[#allocation2] sm:$0x1] %v15_v0 }
   0x3   :  { %17 = vsyncpa [#allocation4], 0 }
   0x4   :  { %19 = vsyncpa [#allocation4 + $0x1], 0  ;;  %s1184_s15 = smov 0   ;;  %s1186_s16 = smov 0  }
   0x5   :  { %s1188_s17 = smov 0   ;;  %s1190_s18 = smov 0  }
   0x6 LB: > { %s1205_s9 = sadd.s32 4294967295, %s1120_s18   ;;  %s920_s19 = sadd.s32 4294967294, %s1120_s18   ;;  %s1120_s18 = sphi %s1190_s18, %s1413_s18   ;;  %s1116_s17 = sphi %s1188_s17, %s1412_s17   ;;  %s1112_s16 = sphi %s1186_s16, %s1411_s16   ;;  %s1108_s15 = sphi %s1184_s15, %s1410_s15  }
   0x7   : > { %s1209_s20 = sadd.s32 1, %s1120_s18   ;;  %s252_s21 = sadd.s32 1, %s1116_s17 }
   0x8   : > { %s249_s22 = ssub.s32 %s1120_s18, %s1209_s20  ;;  %p262_p0 = scmp.ne.s32.totalorder %s1116_s17, %s1112_s16 }
   0x9   : > { %p250_p1 = scmp.eq.s32.totalorder %s249_s22, 0  ;;  %p263_p2 = scmp.eq.s32.totalorder %s1205_s9, 1 }
   0xa   : > { %p268_p3 = scmp.ne.s32.totalorder %s1112_s16, %s1108_s15  ;;  %p269_p4 = scmp.eq.s32.totalorder %s920_s19, 1 }
   0xb   : > { %s1220_s23 = scalar_select %p250_p1, %s1116_s17, %s252_s21  }
   0xc   : > { %p1222_p5 = por %p263_p2, %p262_p0  ;;  %p1226_p6 = por %p269_p4, %p268_p3 }
   0xd   : > { %p923_p7 = scmp.ge.s32.totalorder %s1120_s18, 1  ;;  %p325_p8 = scmp.lt.s32.totalorder %s1120_s18, 3 }
   0xf   : > { %p326_p9 = pnand %p923_p7, %p325_p8 }
  0x10   : > { %p365_p10 = scmp.lt.s32.totalorder (!%p326_p9), %s1205_s9, 1  ;;  %s1122_s21 = smov (!%p326_p9), 127  }
  0x11   : > { %329 = sbr.rel (%p326_p9) target bundleno = 849 (0x351), region = 60  ;;  %s1123_s22 = smov (!%p326_p9), 1  }
  0x12   : > { %s1125_s14 = smov (!%p326_p9), [#allocation3]  }
  0x16   : > { %v381_v1 = vlaneseq  ;;  %s366_s26 = scalar_select %p365_p10, %s1205_s9, 1  ;;  %v376_v9 = vld [vmem:[%s1399_s2] sm:$0xff]  ;;  %vm420_vm0 = vcmask 392192   ;;  %v397_v11 = vld [vmem:[%s1400_s3 + $0x8] sm:$0xff]  ;;  %v1124_v13 = vmov 0   ;;  %v398_v14 = vld [vmem:[%s1400_s3 + $0x10] sm:$0xff] }
  0x17   : > { %976 = vmatprep.mubr.msk.f32.mxu0 %vm420_vm0, %v376_v9  ;;  %v396_v12 = vld [vmem:[%s1400_s3] sm:$0xff]  ;;  %1055 = vset.pattern.permute.xlu1 %v1124_v13  ;;  %v399_v15 = vld [vmem:[%s1400_s3 + $0x18] sm:$0xff]  ;;  %v558_v17 = vld [vmem:[%s1401_s4 + $0x10] sm:$0xff]  ;;  %vm660_vm1 = vcmask 785408  }
  0x18   : > { %v1234_v2 = vshrl.u32 %v381_v1, 7  ;;  %s937_s27 = sshll.u32 %s366_s26, 4  ;;  %s372_s30 = scalar_lea.vmem %s1398_s1, %s366_s26  ;;  %1054 = vset.pattern.permute.xlu0 %v1124_v13  ;;  %v559_v16 = vld [vmem:[%s1401_s4 + $0x18] sm:$0xff]  ;;  %v557_v19 = vld [vmem:[%s1401_s4 + $0x8] sm:$0xff]  ;;  %v586_v20 = vld [vmem:[%s1402_s5 + $0x10] sm:$0xff] }
  0x19   : > { %s369_s13 = scalar_lea.vmem %s1397_s0, %s937_s27  ;;  %v1243_v4 = vld [vmem:[%s372_s30] sm:$0x1]  ;;  %v587_v18 = vld [vmem:[%s1402_s5 + $0x18] sm:$0xff]  ;;  %v585_v22 = vld [vmem:[%s1402_s5 + $0x8] sm:$0xff]  ;;  %s363_s26 = sand.u32 1, %s1112_s16  }
  0x1a   : > { %v383_v3 = vsub.s32 0, %v1234_v2  ;;  %v374_v5 = vld [vmem:[%s369_s13 + $0x8] sm:$0xff]  ;;  %v373_v7 = vld [vmem:[%s369_s13] sm:$0xff]  ;;  %v378_v29 = vld [vmem:[%s1399_s2 + $0x10] sm:$0xff]  ;;  %s934_s27 = sshll.u32 %s1205_s9, 4  ;;  %s364_s28 = scalar_lea.vmem [#allocation3], %s363_s26 }
  0x1b   : > { %v556_v21 = vld [vmem:[%s1401_s4] sm:$0xff]  ;;  %v377_v28 = vld [vmem:[%s1399_s2 + $0x8] sm:$0xff]  ;;  %v379_v30 = vld [vmem:[%s1399_s2 + $0x18] sm:$0xff]  ;;  %s856_s29 = sshll.u32 %s364_s28, 4  ;;  %s854_s11 = scalar_lea.hbm %s1407_s10, %s934_s27  ;;  %s857_s29 = int_to_ptr.vmem [resolvable:$true] %s856_s29 }
  0x1c   : > { %v1248_v6 = vrot.slane %v1243_v4, %v383_v3  ;;  %v584_v23 = vld [vmem:[%s1402_s5] sm:$0xff]  ;;  %s844_s12 = scalar_lea.sflag [#allocation4], %s363_s26  ;;  %s1060_s13 = scalar_lea.vmem %s857_s29, 16 }
  0x1d   : > { %p1061_p11 = scmp.ne.s32.totalorder %s857_s29, %s1060_s13 }
  0x1e   : > { %v387_v8 = vmul.f32 %v1248_v6, %v374_v5  ;;  %v386_v10 = vmul.f32 %v1248_v6, %v373_v7 }
  0x1f   : > { %p1062_p12 = pnand %p1061_p11, %p1222_p5 }
  0x20   : > { %394 = vrot.lane.b32.xlu0 %v387_v8, %s1122_s21  ;;  %390 = vrot.lane.b32.xlu1 %v387_v8, %s1123_s22 }
  0x21   : > { %p1063_p13 = pneg %p1062_p12 }
  0x24   : > { %392 = vrot.lane.b32.xlu0 %v386_v10, %s1122_s21  ;;  %388 = vrot.lane.b32.xlu1 %v386_v10, %s1123_s22 }
  0x28   : > { %407 = vperm.xlu1 %1055, %v397_v11   ;;  %402 = vperm.xlu0 %1054, %v396_v12  }
  0x2c   : > { %412 = vperm.xlu1 %1055, %v398_v14   ;;  %417 = vperm.xlu0 %1054, %v399_v15  }
  0x30   : > { %577 = vperm.xlu1 %1055, %v559_v16   ;;  %572 = vperm.xlu0 %1054, %v558_v17  }
  0x34   : > { %605 = vperm.xlu1 %1055, %v587_v18   ;;  %567 = vperm.xlu0 %1054, %v557_v19  }
  0x38   : > { %600 = vperm.xlu1 %1055, %v586_v20   ;;  %562 = vperm.xlu0 %1054, %v556_v21  }
  0x3c   : > { %595 = vperm.xlu1 %1055, %v585_v22   ;;  %590 = vperm.xlu0 %1054, %v584_v23  }
  0x92   : > { %v395_v24 = vpop.permute.xlu0 %394  ;;  %v391_v26 = vpop.permute.xlu1 %390 }
  0x93   : > { %964 = vmatprep.subr.mxu0 %v395_v24 }
  0x94   : > { %965 = vmatpush3.msra.mxu0 %v395_v24 }
  0x96   : > { %v393_v25 = vpop.permute.xlu0 %392  ;;  %v389_v27 = vpop.permute.xlu1 %388 }
  0x97   : > { %966 = vmatprep.subr.mxu0 %v393_v25 }
  0x98   : > { %967 = vmatpush3.msra.mxu0 %v393_v25 }
  0x99   : > { %968 = vmatprep.subr.mxu0 %v387_v8 }
  0x9a   : > { %969 = vmatpush3.msra.mxu0 %v387_v8 }
  0x9b   : > { %970 = vmatprep.subr.mxu0 %v386_v10 }
  0x9c   : > { %971 = vmatpush3.msra.mxu0 %v386_v10 }
  0x9d   : > { %972 = vmatprep.subr.mxu0 %v391_v26 }
  0x9e   : > { %973 = vmatpush3.msra.mxu0 %v391_v26 }
  0x9f   : > { %974 = vmatprep.subr.mxu0 %v389_v27 }
  0xa0   : > { %975 = vmatpush3.msra.mxu0 %v389_v27 }
  0xa1   : > { %977 = vmatmul.mubr.msk.f32.vlgmr.msra.gmra.mxu0 %vm420_vm0, %v377_v28 }
  0xa2   : > { %979 = vmatprep.mubr.msk.f32.mxu0 %vm420_vm0, %v378_v29 }
  0xa3   : > { %v408_v31 = vpop.permute.xlu1 %407  ;;  %v403_v32 = vpop.permute.xlu0 %402 }
  0xa5   : > { %980 = vmatmul.mubr.msk.f32.gmra.mxu0 %vm420_vm0, %v379_v30 }
  0xa7   : > { %v413_v38 = vpop.permute.xlu1 %412  ;;  %v418_v40 = vpop.permute.xlu0 %417 }
  0xab   : > { %v578_v16 = vpop.permute.xlu1 %577  ;;  %v573_v17 = vpop.permute.xlu0 %572 }
  0xaf   : > { %v606_v18 = vpop.permute.xlu1 %605  ;;  %v568_v19 = vpop.permute.xlu0 %567 }
  0xb3   : > { %v601_v21 = vpop.permute.xlu1 %600  ;;  %v563_v22 = vpop.permute.xlu0 %562 }
 0x161   : > { %v978_v33 = vpop.f32.mrf.mxu0 }
 0x162   : > { %v505_v35 = vadd.f32 %v978_v33, %v408_v31  ;;  %v596_v33 = vpop.permute.xlu1 %595 }
 0x163   : > { %v499_v34 = vpop.f32.mrf.mxu0 }
 0x164   : > { %v500_v36 = vadd.f32 %v499_v34, %v403_v32  ;;  %v519_v42 = vmax.f32 %v505_v35, 0.0  ;;  %v591_v34 = vpop.permute.xlu0 %590 }
 0x165   : > { %v981_v37 = vpop.f32.mrf.mxu0 }
 0x166   : > { %v518_v39 = vmax.f32 %v500_v36, 0.0  ;;  %v515_v43 = vadd.f32 %v981_v37, %v418_v40 }
 0x167   : > { %v509_v41 = vpop.f32.mrf.mxu0 }
 0x168   : > { %v510_v44 = vadd.f32 %v509_v41, %v413_v38  ;;  %v522_v45 = vadd.f32 %v519_v42, %v518_v39  ;;  %v521_v47 = vmax.f32 %v515_v43, 0.0  ;;  %v612_v41 = vld [vmem:[%s1403_s6] sm:$0xff]  ;;  %v638_v43 = vld [vmem:[%s1404_s7 + $0x10] sm:$0xff] }
 0x169   : > { %1006 = vmatprep.mubr.msk.f32.mxu1 %vm660_vm1, %v612_v41 }
 0x16a   : > { %v520_v46 = vmax.f32 %v510_v44, 0.0  ;;  %v639_v44 = vld [vmem:[%s1404_s7 + $0x18] sm:$0xff] }
 0x16c   : > { %v523_v48 = vadd.f32 %v522_v45, %v520_v46  ;;  %v790_v45 = vld [vmem:[%s1405_s8] sm:$0xff] }
 0x16e   : > { %v524_v49 = vadd.f32 %v523_v48, %v521_v47  ;;  %v793_v48 = vld [vmem:[%s1405_s8 + $0x18] sm:$0xff] }
 0x170   : > { %v525_v50 = vrot.slane %v524_v49, 4 }
 0x172   : > { %v526_v51 = vadd.f32 %v525_v50, %v524_v49  ;;  %v830_v49 = vld [vmem:[#allocation2] sm:$0x1] }
 0x174   : > { %v527_v52 = vrot.slane %v526_v51, 2 }
 0x176   : > { %v528_v53 = vadd.f32 %v527_v52, %v526_v51 }
 0x178   : > { %v529_v54 = vrot.slane %v528_v53, 1 }
 0x17a   : > { %v530_v55 = vadd.f32 %v529_v54, %v528_v53 }
 0x17c   : > { %v531_v56 = vmul.f32 0.03125, %v530_v55 }
 0x17e   : > { %v532_v57 = vsub.f32 %v518_v39, %v531_v56  ;;  %v533_v58 = vsub.f32 %v519_v42, %v531_v56  ;;  %v534_v59 = vsub.f32 %v520_v46, %v531_v56  ;;  %v535_v60 = vsub.f32 %v521_v47, %v531_v56  ;;  %v637_v42 = vld [vmem:[%s1404_s7 + $0x8] sm:$0xff]  ;;  %v792_v47 = vld [vmem:[%s1405_s8 + $0x10] sm:$0xff] }
 0x17f   : > { %v791_v46 = vld [vmem:[%s1405_s8 + $0x8] sm:$0xff] }
 0x180   : > { %v536_v61 = vmul.f32 %v532_v57, %v532_v57  ;;  %v537_v62 = vmul.f32 %v533_v58, %v533_v58  ;;  %v538_v63 = vmul.f32 %v534_v59, %v534_v59  ;;  %v539_v1 = vmul.f32 %v535_v60, %v535_v60 }
 0x182   : > { %v540_v0 = vadd.f32 %v537_v62, %v536_v61 }
 0x184   : > { %v541_v5 = vadd.f32 %v540_v0, %v538_v63 }
 0x186   : > { %v542_v7 = vadd.f32 %v541_v5, %v539_v1 }
 0x188   : > { %v543_v8 = vrot.slane %v542_v7, 4 }
 0x18a   : > { %v544_v9 = vadd.f32 %v543_v8, %v542_v7 }
 0x18c   : > { %v545_v10 = vrot.slane %v544_v9, 2 }
 0x18e   : > { %v546_v11 = vadd.f32 %v545_v10, %v544_v9 }
 0x190   : > { %v547_v12 = vrot.slane %v546_v11, 1 }
 0x192   : > { %v548_v13 = vadd.f32 %v547_v12, %v546_v11 }
 0x194   : > { %v549_v14 = vmul.f32 0.03125, %v548_v13 }
 0x196   : > { %v550_v15 = vadd.f32 0.0001, %v549_v14 }
 0x198   : > { %1056 = vrsqrt.f32 %v550_v15 }
 0x1a5   : > { %v1057_v20 = vpop.eup %1056 }
 0x1a6   : > { %v554_v23 = vmul.f32 %v1057_v20, %v534_v59  ;;  %v555_v24 = vmul.f32 %v1057_v20, %v535_v60  ;;  %v553_v25 = vmul.f32 %v1057_v20, %v533_v58  ;;  %v552_v26 = vmul.f32 %v1057_v20, %v532_v57  ;;  %v613_v58 = vld [vmem:[%s1403_s6 + $0x8] sm:$0xff]  ;;  %v614_v59 = vld [vmem:[%s1403_s6 + $0x10] sm:$0xff]  ;;  %v615_v60 = vld [vmem:[%s1403_s6 + $0x18] sm:$0xff] }
 0x1a8   : > { %v582_v27 = vmul.f32 %v573_v17, %v554_v23  ;;  %v583_v28 = vmul.f32 %v578_v16, %v555_v24  ;;  %v581_v29 = vmul.f32 %v568_v19, %v553_v25  ;;  %v580_v30 = vmul.f32 %v563_v22, %v552_v26 }
 0x1aa   : > { %v610_v31 = vadd.f32 %v601_v21, %v582_v27  ;;  %v611_v32 = vadd.f32 %v606_v18, %v583_v28  ;;  %v609_v37 = vadd.f32 %v596_v33, %v581_v29  ;;  %v608_v38 = vadd.f32 %v591_v34, %v580_v30 }
 0x1ac   : > { %v619_v35 = vmul.f32 %v611_v32, %v1248_v6  ;;  %v618_v36 = vmul.f32 %v610_v31, %v1248_v6  ;;  %v617_v39 = vmul.f32 %v609_v37, %v1248_v6  ;;  %v616_v40 = vmul.f32 %v608_v38, %v1248_v6  ;;  %v636_v6 = vld [vmem:[%s1404_s7] sm:$0xff] }
 0x1ae   : > { %634 = vrot.lane.b32.xlu1 %v619_v35, %s1122_s21  ;;  %632 = vrot.lane.b32.xlu0 %v618_v36, %s1122_s21 }
 0x1b2   : > { %630 = vrot.lane.b32.xlu1 %v617_v39, %s1122_s21  ;;  %628 = vrot.lane.b32.xlu0 %v616_v40, %s1122_s21 }
 0x1b6   : > { %626 = vrot.lane.b32.xlu1 %v619_v35, %s1123_s22  ;;  %624 = vrot.lane.b32.xlu0 %v618_v36, %s1123_s22 }
 0x1ba   : > { %622 = vrot.lane.b32.xlu1 %v617_v39, %s1123_s22  ;;  %620 = vrot.lane.b32.xlu0 %v616_v40, %s1123_s22  ;;  %s1064_s22 = sshll.u32 %s1125_s14, 4  ;;  %s1065_s22 = int_to_ptr.vmem [resolvable:$false] %s1064_s22 }
 0x1bb   : > { %s1066_s9 = scalar_lea.vmem %s1065_s22, 32  ;;  %p1067_p0 = scmp.lt.s32.totalorder %s857_s29, %s1065_s22 }
 0x1bc   : > { %p1068_p1 = scmp.lt.s32.totalorder %s1066_s9, %s1060_s13 }
 0x1be   : > { %642 = vperm.xlu1 %1055, %v636_v6   ;;  %647 = vperm.xlu0 %1054, %v637_v42   ;;  %p1069_p2 = por %p1068_p1, %p1067_p0 }
 0x1c0   : > { %p1070_p3 = pnand %p1069_p2, %p1063_p13 }
 0x1c2   : > { %652 = vperm.xlu1 %1055, %v638_v43   ;;  %657 = vperm.xlu0 %1054, %v639_v44  }
 0x1c6   : > { %796 = vperm.xlu1 %1055, %v790_v45   ;;  %801 = vperm.xlu0 %1054, %v791_v46  }
 0x1ca   : > { %806 = vperm.xlu1 %1055, %v792_v47   ;;  %811 = vperm.xlu0 %1054, %v793_v48  }
 0x1ce   : > { %833 = vperm.xlu1 %1055, %v830_v49  }
 0x220   : > { %v635_v50 = vpop.permute.xlu1 %634  ;;  %v633_v51 = vpop.permute.xlu0 %632 }
 0x221   : > { %982 = vmatprep.subr.mxu1 %v635_v50 }
 0x222   : > { %983 = vmatpush3.msra.mxu1 %v635_v50 }
 0x223   : > { %984 = vmatprep.subr.mxu1 %v633_v51 }
 0x224   : > { %v631_v52 = vpop.permute.xlu1 %630  ;;  %985 = vmatpush3.msra.mxu1 %v633_v51  ;;  %v629_v53 = vpop.permute.xlu0 %628 }
 0x225   : > { %986 = vmatprep.subr.mxu1 %v631_v52 }
 0x226   : > { %987 = vmatpush3.msra.mxu1 %v631_v52 }
 0x227   : > { %988 = vmatprep.subr.mxu1 %v629_v53 }
 0x228   : > { %989 = vmatpush3.msra.mxu1 %v629_v53  ;;  %v627_v54 = vpop.permute.xlu1 %626  ;;  %v625_v55 = vpop.permute.xlu0 %624 }
 0x229   : > { %990 = vmatprep.subr.mxu1 %v619_v35 }
 0x22a   : > { %991 = vmatpush3.msra.mxu1 %v619_v35 }
 0x22b   : > { %992 = vmatprep.subr.mxu1 %v618_v36 }
 0x22c   : > { %993 = vmatpush3.msra.mxu1 %v618_v36  ;;  %v623_v56 = vpop.permute.xlu1 %622  ;;  %v621_v57 = vpop.permute.xlu0 %620 }
 0x22d   : > { %994 = vmatprep.subr.mxu1 %v617_v39 }
 0x22e   : > { %995 = vmatpush3.msra.mxu1 %v617_v39 }
 0x22f   : > { %996 = vmatprep.subr.mxu1 %v616_v40 }
 0x230   : > { %997 = vmatpush3.msra.mxu1 %v616_v40 }
 0x231   : > { %998 = vmatprep.subr.mxu1 %v627_v54 }
 0x232   : > { %999 = vmatpush3.msra.mxu1 %v627_v54 }
 0x233   : > { %1000 = vmatprep.subr.mxu1 %v625_v55 }
 0x234   : > { %1001 = vmatpush3.msra.mxu1 %v625_v55 }
 0x235   : > { %1002 = vmatprep.subr.mxu1 %v623_v56 }
 0x236   : > { %1003 = vmatpush3.msra.mxu1 %v623_v56 }
 0x237   : > { %1004 = vmatprep.subr.mxu1 %v621_v57 }
 0x238   : > { %1005 = vmatpush3.msra.mxu1 %v621_v57 }
 0x239   : > { %1007 = vmatmul.mubr.msk.f32.vlgmr.msra.gmra.mxu1 %vm660_vm1, %v613_v58  ;;  %v643_v61 = vpop.permute.xlu1 %642  ;;  %v648_v62 = vpop.permute.xlu0 %647 }
 0x23a   : > { %1009 = vmatprep.mubr.msk.f32.mxu1 %vm660_vm1, %v614_v59 }
 0x23d   : > { %1010 = vmatmul.mubr.msk.f32.gmra.mxu1 %vm660_vm1, %v615_v60  ;;  %v653_v8 = vpop.permute.xlu1 %652  ;;  %v658_v10 = vpop.permute.xlu0 %657 }
 0x241   : > { %v797_v30 = vpop.permute.xlu1 %796  ;;  %v802_v31 = vpop.permute.xlu0 %801 }
 0x245   : > { %v807_v6 = vpop.permute.xlu1 %806  ;;  %v812_v46 = vpop.permute.xlu0 %811 }
 0x2f9   : > { %v1008_v63 = vpop.f32.mrf.mxu1 }
 0x2fa   : > { %v745_v1 = vadd.f32 %v1008_v63, %v648_v62 }
 0x2fb   : > { %v739_v0 = vpop.f32.mrf.mxu1 }
 0x2fc   : > { %v740_v5 = vadd.f32 %v739_v0, %v643_v61  ;;  %v759_v12 = vmax.f32 %v745_v1, 0.0  ;;  %v834_v61 = vpop.permute.xlu1 %833 }
 0x2fd   : > { %v1011_v7 = vpop.f32.mrf.mxu1  ;;  %v839_v0 = vrot.slane %v834_v61, %v383_v3 }
 0x2fe   : > { %v758_v9 = vmax.f32 %v740_v5, 0.0  ;;  %v755_v13 = vadd.f32 %v1011_v7, %v658_v10 }
 0x2ff   : > { %v749_v11 = vpop.f32.mrf.mxu1 }
 0x300   : > { %v750_v14 = vadd.f32 %v749_v11, %v653_v8  ;;  %v762_v15 = vadd.f32 %v759_v12, %v758_v9  ;;  %v761_v17 = vmax.f32 %v755_v13, 0.0 }
 0x302   : > { %v760_v16 = vmax.f32 %v750_v14, 0.0 }
 0x304   : > { %v763_v18 = vadd.f32 %v762_v15, %v760_v16 }
 0x306   : > { %v764_v19 = vadd.f32 %v763_v18, %v761_v17 }
 0x308   : > { %v765_v20 = vrot.slane %v764_v19, 4 }
 0x30a   : > { %v766_v21 = vadd.f32 %v765_v20, %v764_v19 }
 0x30c   : > { %v767_v22 = vrot.slane %v766_v21, 2 }
 0x30e   : > { %v768_v23 = vadd.f32 %v767_v22, %v766_v21 }
 0x310   : > { %v769_v24 = vrot.slane %v768_v23, 1 }
 0x312   : > { %v770_v25 = vadd.f32 %v769_v24, %v768_v23 }
 0x314   : > { %v771_v26 = vmul.f32 0.03125, %v770_v25 }
 0x316   : > { %v772_v27 = vsub.f32 %v758_v9, %v771_v26  ;;  %v773_v28 = vsub.f32 %v759_v12, %v771_v26  ;;  %v774_v29 = vsub.f32 %v760_v16, %v771_v26  ;;  %v775_v32 = vsub.f32 %v761_v17, %v771_v26 }
 0x318   : > { %v776_v33 = vmul.f32 %v772_v27, %v772_v27  ;;  %v777_v34 = vmul.f32 %v773_v28, %v773_v28  ;;  %v814_v35 = vmul.f32 %v797_v30, %v772_v27  ;;  %v815_v36 = vmul.f32 %v802_v31, %v773_v28 }
 0x319   : > { %v778_v37 = vmul.f32 %v774_v29, %v774_v29  ;;  %v779_v39 = vmul.f32 %v775_v32, %v775_v32  ;;  %v816_v43 = vmul.f32 %v807_v6, %v774_v29  ;;  %v817_v48 = vmul.f32 %v812_v46, %v775_v32 }
 0x31a   : > { %v780_v38 = vadd.f32 %v777_v34, %v776_v33  ;;  %v818_v41 = vadd.f32 %v815_v36, %v814_v35 }
 0x31c   : > { %v781_v40 = vadd.f32 %v780_v38, %v778_v37  ;;  %v819_v45 = vadd.f32 %v818_v41, %v816_v43 }
 0x31e   : > { %v782_v42 = vadd.f32 %v781_v40, %v779_v39  ;;  %v820_v50 = vadd.f32 %v819_v45, %v817_v48 }
 0x320   : > { %v783_v44 = vrot.slane %v782_v42, 4  ;;  %v821_v53 = vrot.slane %v820_v50, 4 }
 0x322   : > { %v784_v47 = vadd.f32 %v783_v44, %v782_v42  ;;  %v822_v56 = vadd.f32 %v821_v53, %v820_v50 }
 0x324   : > { %v785_v49 = vrot.slane %v784_v47, 2  ;;  %v823_v58 = vrot.slane %v822_v56, 2 }
 0x326   : > { %v786_v51 = vadd.f32 %v785_v49, %v784_v47  ;;  %v824_v59 = vadd.f32 %v823_v58, %v822_v56 }
 0x328   : > { %v787_v52 = vrot.slane %v786_v51, 1  ;;  %v825_v60 = vrot.slane %v824_v59, 1 }
 0x32a   : > { %v788_v54 = vadd.f32 %v787_v52, %v786_v51  ;;  %v826_v62 = vadd.f32 %v825_v60, %v824_v59 }
 0x32c   : > { %v789_v55 = vmul.f32 0.03125, %v788_v54 }
 0x32e   : > { %v827_v57 = vadd.f32 0.0001, %v789_v55 }
 0x330   : > { %1058 = vrsqrt.f32 %v827_v57 }
 0x33d   : > { %v1059_v63 = vpop.eup %1058 }
 0x33e   : > { %v829_v1 = vmul.f32 %v1059_v63, %v826_v62 }
 0x340   : > { %v840_v5 = vadd.f32 %v839_v0, %v829_v1 }
 0x342   : > { %v841_v7 = vmul.f32 %v840_v5, %v1243_v4 }
 0x344   : > { %842 = vst [vmem:[%s364_s28] sm:$0x1] %v841_v7 }
 0x345   : > { %1073 = shalt.err (!%p1070_p3)
}
 0x346   : > { %s1074_s19 = scalar_lea.hbm %s854_s11, 16  ;;  %s1078_s28 = scalar_lea.hbm %s1407_s10, 32 }
 0x347   : > { %p1075_p4 = scmp.ne.s32.totalorder %s854_s11, %s1074_s19  ;;  %p1079_p9 = scmp.lt.s32.totalorder %s854_s11, %s1407_s10 }
 0x348   : > { %p1080_p10 = scmp.lt.s32.totalorder %s1078_s28, %s1074_s19 }
 0x349   : > { %p1076_p7 = pnand %p1075_p4, %p1222_p5 }
 0x34a   : > { %p1081_p11 = por %p1080_p10, %p1079_p9 }
 0x34b   : > { %p1077_p8 = pneg %p1076_p7 }
 0x34d   : > { %p1082_p12 = pnand %p1081_p11, %p1077_p8 }
 0x34f   : > { %1085 = shalt.err (!%p1082_p12)
}
 0x350   : > { %1012 = dma.vmem_to_hbm [thread:$0]  (%p1222_p5), %s857_s29, 16, %s854_s11, %s844_s12  }
 0x351 PF: > { %p1018_p13 = scmp.ge.s32.totalorder %s1120_s18, 2  ;;  %s868_s13 = sand.u32 1, %s1108_s15  }
 0x352   : > { %s869_s14 = scalar_lea.sflag [#allocation4], %s868_s13 }
 0x353   : > { %p1015_p0 = pnand %p1018_p13, %p1226_p6 }
 0x355   : > { %p1016_p1 = pneg %p1015_p0 }
 0x357   : > { %1103 = dma.done.wait (%p1016_p1), %s869_s14, 16  }
 0x358   : > { %1105 = vsyncadd (%p1016_p1), %s869_s14, 4294967280  ;;  %p22_p2 = scmp.ge.s32.totalorder %s1209_s20, 4   ;;  %s1410_s15 = smov %s1112_s16 }
 0x359   : > { %s1411_s16 = smov %s1116_s17  ;;  %s1412_s17 = smov %s1220_s23 }
 0x35a   : > { %s1413_s18 = smov %s1209_s20  ;;  %24 = sbr.rel (!%p22_p2) target bundleno = 6 (0x6), region = 98 }
 0x35f   :  { %873 = vsyncpa [#allocation4], 1 }
 0x360   :  { %875 = vsyncpa [#allocation4 + $0x1], 1 }

</bundles_post_ra>
